<compile_context>
chip_gen: v7x
topology: tpu7x:2x2x1
jax: 0.10.0
libtpu: 0.0.40
codegen_flags: <defaults>
</compile_context>

<pallas_src>
import jax
import jax.numpy as jnp
from jax.experimental import pallas as pl
from jax.experimental.pallas import tpu as pltpu


def hetero_gcn_kernel(mt_ref, xt_ref, w1t_ref, w2t_ref, b1s_ref, b2s_ref, out_ref):
    """Full (transposed) HeteroGCN forward for one small graph held in VMEM.

    mt_ref  : (E*N, N) bf16  stacked normalized adjacency transposes:
                              mt[e*N + j, i] = A_e[i, j]
    xt_ref  : (F, N)   bf16  input node features, transposed
    w1t_ref : (E, H, F) bf16 layer-1 GraphConv weights, transposed per etype
    w2t_ref : (E, 1, H) bf16 layer-2 GraphConv weights, transposed (out_feats=1)
    b1s_ref : (H, 1)   f32   sum over edge types of layer-1 bias (hoisted)
    b2s_ref : (1,)     f32   sum over edge types of layer-2 bias (SMEM scalar)
    out_ref : (1, N)   f32   lane-dense output row (squeeze/transpose in wrapper)
    """
    E = w1t_ref.shape[0]
    xt = xt_ref[...]                                   # (F, N) bf16
    mt = mt_ref[...]                                   # (E*N, N) bf16

    # ---- layer 1: project first, stack per-etype along K, one MXU dot ----
    # p1t[:, e*N:(e+1)*N] = (X @ W1_e)^T
    p1t = jnp.concatenate(
        [jnp.dot(w1t_ref[e], xt, preferred_element_type=jnp.float32)
         for e in range(E)],                           # E is small & static
        axis=1,
    ).astype(jnp.bfloat16)                             # (H, E*N)
    # single stacked-K contraction == sum over edge types of A_e @ (X @ W1_e)
    h1t = jnp.dot(p1t, mt, preferred_element_type=jnp.float32)   # (H, N) f32
    h1t = jnp.maximum(h1t + b1s_ref[...], 0.0)         # hoisted bias + ReLU, f32
    h1t_b = h1t.astype(jnp.bfloat16)

    # ---- layer 2 (out_feats = 1): same stacked-K trick, MXU all the way ----
    # qt[0, e*N:(e+1)*N] = (h1 @ W2_e)^T
    qt = jnp.concatenate(
        [jnp.dot(w2t_ref[e], h1t_b, preferred_element_type=jnp.float32)
         for e in range(E)],
        axis=1,
    ).astype(jnp.bfloat16)                             # (1, E*N)
    h2t = jnp.dot(qt, mt, preferred_element_type=jnp.float32)    # (1, N) f32

    out_ref[...] = h2t + b2s_ref[0]                    # lane-dense store


@jax.jit
def hetero_gcn_forward(a_norm, x, w1, b1, w2, b2):
    """Wrapper: layout glue (transpose / stack / bias hoist / bf16 cast) + pallas_call."""
    E, N, _ = a_norm.shape
    H = w1.shape[-1]

    # Stacked adjacency-transpose slab: mt[e*N + j, i] = A_e[i, j]
    mt = jnp.transpose(a_norm, (0, 2, 1)).reshape(E * N, N).astype(jnp.bfloat16)
    xt = x.T.astype(jnp.bfloat16)                              # (F, N)
    w1t = jnp.transpose(w1, (0, 2, 1)).astype(jnp.bfloat16)    # (E, H, F)
    w2t = jnp.transpose(w2, (0, 2, 1)).astype(jnp.bfloat16)    # (E, 1, H)
    b1s = b1.sum(axis=0).reshape(H, 1).astype(jnp.float32)     # hoisted bias sums
    b2s = jnp.reshape(b2.sum(), (1,)).astype(jnp.float32)

    vmem = pl.BlockSpec(memory_space=pltpu.MemorySpace.VMEM)
    smem = pl.BlockSpec(memory_space=pltpu.MemorySpace.SMEM)
    out = pl.pallas_call(
        hetero_gcn_kernel,
        out_shape=jax.ShapeDtypeStruct((1, N), jnp.float32),
        in_specs=[vmem, vmem, vmem, vmem, vmem, smem],
        out_specs=vmem,
    )(mt, xt, w1t, w2t, b1s, b2s)
    return out[0]                                              # (N,)


# ----------------------- glue: synthetic graph + params -----------------------

def build_norm_adj(key, num_etypes, n_nodes, p=0.06):
    """Dense DGL-GraphConv(norm='both') normalized adjacency per edge type.

    A[i, j] = 1 if edge j -> i.  A_norm = D_in^{-1/2} A D_out^{-1/2}, degrees >= 1.
    """
    adjs = []
    for _ in range(num_etypes):
        key, sub = jax.random.split(key)
        a = (jax.random.uniform(sub, (n_nodes, n_nodes)) < p).astype(jnp.float32)
        deg_in = jnp.maximum(a.sum(axis=1), 1.0)     # row sum = in-degree of dst
        deg_out = jnp.maximum(a.sum(axis=0), 1.0)    # col sum = out-degree of src
        a_norm = a * (1.0 / jnp.sqrt(deg_in))[:, None] * (1.0 / jnp.sqrt(deg_out))[None, :]
        adjs.append(a_norm)
    return jnp.stack(adjs), key


def init_params(key, num_etypes, in_feats, hidden_feats):
    """Xavier-uniform W, zero bias (DGL GraphConv defaults)."""
    def xavier(k, shape):
        fan_in, fan_out = shape[-2], shape[-1]
        lim = jnp.sqrt(6.0 / (fan_in + fan_out))
        return jax.random.uniform(k, shape, jnp.float32, -lim, lim)

    k1, k2 = jax.random.split(key)
    w1 = xavier(k1, (num_etypes, in_feats, hidden_feats))
    b1 = jnp.zeros((num_etypes, hidden_feats), jnp.float32)
    w2 = xavier(k2, (num_etypes, hidden_feats, 1))
    b2 = jnp.zeros((num_etypes, 1), jnp.float32)
    return w1, b1, w2, b2


def ref_forward(a_norm, x, w1, b1, w2, b2):
    """Pure-JAX f32 reference of the HeteroGCN forward."""
    E = a_norm.shape[0]
    h1 = sum(a_norm[e] @ (x @ w1[e]) + b1[e][None, :] for e in range(E))
    h1 = jnp.maximum(h1, 0.0)
    h2 = sum(a_norm[e] @ (h1 @ w2[e]) + b2[e][None, :] for e in range(E))
    return h2[:, 0]


if __name__ == "__main__":
    # Small synthetic stand-in for FraudYelp: one node type 'review',
    # three edge types ('net_rsr', 'net_rtr', 'net_rur').
    N_NODES = 128
    IN_FEATS = 32
    HIDDEN_FEATS = 16
    EDGE_TYPES = 3

    key = jax.random.PRNGKey(0)
    key, kx, kp = jax.random.split(key, 3)

    a_norm, key = build_norm_adj(key, EDGE_TYPES, N_NODES)          # (E, N, N)
    x = jax.random.normal(kx, (N_NODES, IN_FEATS), jnp.float32)     # (N, F)
    w1, b1, w2, b2 = init_params(kp, EDGE_TYPES, IN_FEATS, HIDDEN_FEATS)

    out = hetero_gcn_forward(a_norm, x, w1, b1, w2, b2)
    out = jax.block_until_ready(out)

    ref = ref_forward(a_norm, x, w1, b1, w2, b2)
    assert out.shape == (N_NODES,)
    # bf16 MXU inputs with f32 accumulation -> compare to the f32 reference
    # with a correspondingly looser tolerance.
    assert jnp.allclose(out, ref, atol=1e-1, rtol=5e-2), "mismatch vs pure-JAX reference"

    print("KERNEL_OK")
</pallas_src>

<mosaic_0001>
module attributes {stable_mosaic.version = 11 : i64} {
  func.func @hetero_gcn_kernel(%arg0: memref<384x128xbf16, #tpu.memory_space<vmem>>, %arg1: memref<32x128xbf16, #tpu.memory_space<vmem>>, %arg2: memref<3x16x32xbf16, #tpu.memory_space<vmem>>, %arg3: memref<3x1x16xbf16, #tpu.memory_space<vmem>>, %arg4: memref<16x1xf32, #tpu.memory_space<vmem>>, %arg5: memref<1xf32, #tpu.memory_space<smem>>, %arg6: memref<1x128xf32, #tpu.memory_space<vmem>>) attributes {dimension_semantics = [], scalar_prefetch = 0 : i64, scratch_operands = 0 : i64, tpu.core_type = #tpu.core_type<tc>} {
    %c0 = arith.constant 0 : index
    %c0_0 = arith.constant 0 : index
    %0 = vector.load %arg1[%c0, %c0_0] : memref<32x128xbf16, #tpu.memory_space<vmem>>, vector<32x128xbf16>
    %c0_1 = arith.constant 0 : index
    %c0_2 = arith.constant 0 : index
    %1 = vector.load %arg0[%c0_1, %c0_2] : memref<384x128xbf16, #tpu.memory_space<vmem>>, vector<384x128xbf16>
    %c0_3 = arith.constant 0 : index
    %c0_4 = arith.constant 0 : index
    %c0_5 = arith.constant 0 : index
    %2 = vector.load %arg2[%c0_3, %c0_4, %c0_5] : memref<3x16x32xbf16, #tpu.memory_space<vmem>>, vector<1x16x32xbf16>
    %3 = vector.shape_cast %2 : vector<1x16x32xbf16> to vector<16x32xbf16>
    %cst = arith.constant dense<0.000000e+00> : vector<16x128xf32>
    %4 = tpu.matmul %3, %0, %cst {dimension_numbers = #tpu.dot_dimension_numbers<[1], [0], [0], [1], [0, 0, 1, 1], [], []>} : vector<16x32xbf16>, vector<32x128xbf16>, vector<16x128xf32> -> vector<16x128xf32>
    %c1 = arith.constant 1 : index
    %c0_6 = arith.constant 0 : index
    %c0_7 = arith.constant 0 : index
    %5 = vector.load %arg2[%c1, %c0_6, %c0_7] : memref<3x16x32xbf16, #tpu.memory_space<vmem>>, vector<1x16x32xbf16>
    %6 = vector.shape_cast %5 : vector<1x16x32xbf16> to vector<16x32xbf16>
    %cst_8 = arith.constant dense<0.000000e+00> : vector<16x128xf32>
    %7 = tpu.matmul %6, %0, %cst_8 {dimension_numbers = #tpu.dot_dimension_numbers<[1], [0], [0], [1], [0, 0, 1, 1], [], []>} : vector<16x32xbf16>, vector<32x128xbf16>, vector<16x128xf32> -> vector<16x128xf32>
    %c2 = arith.constant 2 : index
    %c0_9 = arith.constant 0 : index
    %c0_10 = arith.constant 0 : index
    %8 = vector.load %arg2[%c2, %c0_9, %c0_10] : memref<3x16x32xbf16, #tpu.memory_space<vmem>>, vector<1x16x32xbf16>
    %9 = vector.shape_cast %8 : vector<1x16x32xbf16> to vector<16x32xbf16>
    %cst_11 = arith.constant dense<0.000000e+00> : vector<16x128xf32>
    %10 = tpu.matmul %9, %0, %cst_11 {dimension_numbers = #tpu.dot_dimension_numbers<[1], [0], [0], [1], [0, 0, 1, 1], [], []>} : vector<16x32xbf16>, vector<32x128xbf16>, vector<16x128xf32> -> vector<16x128xf32>
    %11 = tpu.concatenate %4, %7, %10 in 1 : vector<16x128xf32>, vector<16x128xf32>, vector<16x128xf32> -> vector<16x384xf32>
    %12 = arith.truncf %11 : vector<16x384xf32> to vector<16x384xbf16>
    %cst_12 = arith.constant dense<0.000000e+00> : vector<16x128xf32>
    %13 = tpu.matmul %12, %1, %cst_12 {dimension_numbers = #tpu.dot_dimension_numbers<[1], [0], [0], [1], [0, 0, 1, 1], [], []>} : vector<16x384xbf16>, vector<384x128xbf16>, vector<16x128xf32> -> vector<16x128xf32>
    %c0_13 = arith.constant 0 : index
    %c0_14 = arith.constant 0 : index
    %14 = vector.load %arg4[%c0_13, %c0_14] : memref<16x1xf32, #tpu.memory_space<vmem>>, vector<16x1xf32>
    %15 = vector.broadcast %14 : vector<16x1xf32> to vector<16x128xf32>
    %16 = arith.addf %13, %15 : vector<16x128xf32>
    %cst_15 = arith.constant 0.000000e+00 : f32
    %17 = vector.broadcast %cst_15 : f32 to vector<16x128xf32>
    %18 = arith.maximumf %16, %17 : vector<16x128xf32>
    %19 = arith.truncf %18 : vector<16x128xf32> to vector<16x128xbf16>
    %c0_16 = arith.constant 0 : index
    %c0_17 = arith.constant 0 : index
    %c0_18 = arith.constant 0 : index
    %20 = vector.load %arg3[%c0_16, %c0_17, %c0_18] : memref<3x1x16xbf16, #tpu.memory_space<vmem>>, vector<1x1x16xbf16>
    %21 = vector.shape_cast %20 : vector<1x1x16xbf16> to vector<1x16xbf16>
    %cst_19 = arith.constant dense<0.000000e+00> : vector<1x128xf32>
    %22 = tpu.matmul %21, %19, %cst_19 {dimension_numbers = #tpu.dot_dimension_numbers<[1], [0], [0], [1], [0, 0, 1, 1], [], []>} : vector<1x16xbf16>, vector<16x128xbf16>, vector<1x128xf32> -> vector<1x128xf32>
    %c1_20 = arith.constant 1 : index
    %c0_21 = arith.constant 0 : index
    %c0_22 = arith.constant 0 : index
    %23 = vector.load %arg3[%c1_20, %c0_21, %c0_22] : memref<3x1x16xbf16, #tpu.memory_space<vmem>>, vector<1x1x16xbf16>
    %24 = vector.shape_cast %23 : vector<1x1x16xbf16> to vector<1x16xbf16>
    %cst_23 = arith.constant dense<0.000000e+00> : vector<1x128xf32>
    %25 = tpu.matmul %24, %19, %cst_23 {dimension_numbers = #tpu.dot_dimension_numbers<[1], [0], [0], [1], [0, 0, 1, 1], [], []>} : vector<1x16xbf16>, vector<16x128xbf16>, vector<1x128xf32> -> vector<1x128xf32>
    %c2_24 = arith.constant 2 : index
    %c0_25 = arith.constant 0 : index
    %c0_26 = arith.constant 0 : index
    %26 = vector.load %arg3[%c2_24, %c0_25, %c0_26] : memref<3x1x16xbf16, #tpu.memory_space<vmem>>, vector<1x1x16xbf16>
    %27 = vector.shape_cast %26 : vector<1x1x16xbf16> to vector<1x16xbf16>
    %cst_27 = arith.constant dense<0.000000e+00> : vector<1x128xf32>
    %28 = tpu.matmul %27, %19, %cst_27 {dimension_numbers = #tpu.dot_dimension_numbers<[1], [0], [0], [1], [0, 0, 1, 1], [], []>} : vector<1x16xbf16>, vector<16x128xbf16>, vector<1x128xf32> -> vector<1x128xf32>
    %29 = tpu.concatenate %22, %25, %28 in 1 : vector<1x128xf32>, vector<1x128xf32>, vector<1x128xf32> -> vector<1x384xf32>
    %30 = arith.truncf %29 : vector<1x384xf32> to vector<1x384xbf16>
    %cst_28 = arith.constant dense<0.000000e+00> : vector<1x128xf32>
    %31 = tpu.matmul %30, %1, %cst_28 {dimension_numbers = #tpu.dot_dimension_numbers<[1], [0], [0], [1], [0, 0, 1, 1], [], []>} : vector<1x384xbf16>, vector<384x128xbf16>, vector<1x128xf32> -> vector<1x128xf32>
    %c0_29 = arith.constant 0 : index
    %32 = memref.load %arg5[%c0_29] : memref<1xf32, #tpu.memory_space<smem>>
    %33 = vector.broadcast %32 : f32 to vector<1x128xf32>
    %34 = arith.addf %31, %33 : vector<1x128xf32>
    %c0_30 = arith.constant 0 : index
    %c0_31 = arith.constant 0 : index
    %35 = vector.load %arg6[%c0_30, %c0_31] : memref<1x128xf32, #tpu.memory_space<vmem>>, vector<1x128xf32>
    tpu.vector_store %arg6[%c0_30, %c0_31], %34 {strides = array<i32>} : memref<1x128xf32, #tpu.memory_space<vmem>>, vector<1x128xf32>,
    return
  }
}

</mosaic_0001>

<bundles_post_ra>
// kernel: hetero_gcn_forward.1
= control target key start
LH: loop header
LB: loop body
LE: loop exit
PB: predicated region body
PF: predicated region fallthrough
CT: control target
= control target key end

     0   :  { %v983_v1 = vmov 0.0   ;;  %vm984_vm0 = vmmov 0   ;;  %vm97_vm1 = vcmask 261120   ;;  %s1279_s0 = inlined_call_operand.vmem [shape: bf16[384,128], index: 0, kind: input, shape index: {}]   ;;  %s1280_s1 = inlined_call_operand.vmem [shape: bf16[32,128], index: 1, kind: input, shape index: {}]   ;;  %s1281_s2 = inlined_call_operand.vmem [shape: bf16[3,16,32], index: 2, kind: input, shape index: {}]   ;;  %s1282_s3 = inlined_call_operand.vmem [shape: bf16[3,1,16], index: 3, kind: input, shape index: {}]   ;;  %s1283_s4 = inlined_call_operand.vmem [shape: f32[16,1], index: 4, kind: input, shape index: {}]   ;;  %s1284_s5 = inlined_call_operand.<no memory space> [shape: f32[1], index: 5, kind: input, shape index: {}]   ;;  %s1285_s6 = inlined_call_operand.hbm [shape: f32[1,128], index: 6, kind: output, shape index: {}]  }
   0x1   :  { %v930_v0 = vld [vmem:[%s1280_s1] sm:$0xff]   ;;  %843 = vmatprep.subr.bf16.mxu0 %v983_v1  ;;  %851 = vmatprep.subr.bf16.mxu1 %v983_v1  ;;  %v931_v2 = vld [vmem:[%s1280_s1 + $0x8] sm:$0xff]   ;;  %v1074_v9 = vld [vmem:[%s1279_s0 + $0x50] sm:$0xff]  }
   0x2   :  { %844 = vmatpush3.bf16.msra.mxu0 %v930_v0  ;;  %852 = vmatpush3.bf16.msra.mxu1 %v930_v0  ;;  %v932_v3 = vld [vmem:[%s1281_s2] sm:$0xff]   ;;  %v933_v4 = vld [vmem:[%s1281_s2 + $0x8] sm:$0xff]   ;;  %v934_v10 = vld [vmem:[%s1281_s2 + $0x10] sm:$0xff]  }
   0x3   :  { %845 = vmatprep.subr.bf16.mxu0 %v983_v1  ;;  %853 = vmatprep.subr.bf16.mxu1 %v983_v1  ;;  %v1045_v5 = vld [vmem:[%s1279_s0 + $0x40] sm:$0xff]   ;;  %v1057_v7 = vld [vmem:[%s1279_s0 + $0x48] sm:$0xff]   ;;  %v1089_v12 = vld [vmem:[%s1279_s0 + $0x10] sm:$0xff]  }
   0x4   :  { %847 = vmatprep.mubr.msk.bf16.mxu0 %vm984_vm0, %v983_v1  ;;  %855 = vmatprep.mubr.msk.bf16.mxu1 %vm984_vm0, %v983_v1  ;;  %v1052_v6 = vld [vmem:[%s1279_s0] sm:$0xff]   ;;  %v1068_v8 = vld [vmem:[%s1279_s0 + $0x8] sm:$0xff]   ;;  %v1095_v13 = vld [vmem:[%s1279_s0 + $0x58] sm:$0xff]  }
   0x5   :  { %v1082_v11 = vld [vmem:[%s1279_s0 + $0x80] sm:$0xff]   ;;  %v1102_v14 = vld [vmem:[%s1279_s0 + $0x88] sm:$0xff]   ;;  %v1111_v15 = vld [vmem:[%s1279_s0 + $0x18] sm:$0xff]  }
   0x6   :  { %846 = vmatpush3.bf16.msra.mxu0 %v931_v2  ;;  %854 = vmatpush3.bf16.msra.mxu1 %v931_v2  ;;  %v1117_v16 = vld [vmem:[%s1279_s0 + $0x60] sm:$0xff]   ;;  %v1122_v17 = vld [vmem:[%s1279_s0 + $0x90] sm:$0xff]   ;;  %v1135_v19 = vld [vmem:[%s1279_s0 + $0x68] sm:$0xff]  }
   0x7   :  { %859 = vmatprep.subr.bf16.mxu0 %v983_v1  ;;  %775 = vmatprep.subr.bf16.mxu1 %v1045_v5  ;;  %v1128_v18 = vld [vmem:[%s1279_s0 + $0x20] sm:$0xff]   ;;  %v1141_v20 = vld [vmem:[%s1279_s0 + $0x98] sm:$0xff]   ;;  %v1149_v21 = vld [vmem:[%s1279_s0 + $0x28] sm:$0xff]  }
   0x9   :  { %848 = vmatmul.mubr.msk.bf16.vlgmr.msra.gmra.mrb[0].mxu0 %vm97_vm1, %v932_v3  ;;  %856 = vmatmul.mubr.msk.bf16.vlgmr.msra.gmra.mrb[0].mxu1 %vm97_vm1, %v933_v4 }
   0xa   :  { %860 = vmatpush3.bf16.msra.mxu0 %v930_v0  ;;  %863 = vmatprep.mubr.msk.bf16.mxu0 %vm984_vm0, %v983_v1 }
   0xb   :  { %861 = vmatprep.subr.bf16.mxu0 %v983_v1  ;;  %776 = vmatpush3.bf16.msra.mxu1 %v1052_v6 }
   0xc   :  { %777 = vmatprep.subr.bf16.mxu1 %v1057_v7 }
   0xe   :  { %862 = vmatpush3.bf16.msra.mxu0 %v931_v2 }
   0xf   :  { %778 = vmatpush3.bf16.msra.mxu1 %v1068_v8  ;;  %867 = vmatprep.subr.bf16.mxu0 %v983_v1 }
  0x10   :  { %779 = vmatprep.subr.bf16.mxu1 %v1074_v9 }
  0x11   :  { %864 = vmatmul.mubr.msk.bf16.vlgmr.msra.gmra.mrb[4].mxu0 %vm97_vm1, %v934_v10 }
  0x12   :  { %868 = vmatpush3.bf16.msra.mxu0 %v1082_v11  ;;  %883 = vmatprep.mubr.msk.bf16.mxu0 %vm984_vm0, %v983_v1 }
  0x13   :  { %780 = vmatpush3.bf16.msra.mxu1 %v1089_v12  ;;  %869 = vmatprep.subr.bf16.mxu0 %v983_v1 }
  0x14   :  { %781 = vmatprep.subr.bf16.mxu1 %v1095_v13 }
  0x16   :  { %870 = vmatpush3.bf16.msra.mxu0 %v1102_v14 }
  0x17   :  { %782 = vmatpush3.bf16.msra.mxu1 %v1111_v15  ;;  %871 = vmatprep.subr.bf16.mxu0 %v983_v1 }
  0x18   :  { %783 = vmatprep.subr.bf16.mxu1 %v1117_v16 }
  0x1a   :  { %872 = vmatpush3.bf16.msra.mxu0 %v1122_v17 }
  0x1b   :  { %784 = vmatpush3.bf16.msra.mxu1 %v1128_v18  ;;  %873 = vmatprep.subr.bf16.mxu0 %v983_v1 }
  0x1c   :  { %12 = vsyncpa [#allocation4], 0  ;;  %785 = vmatprep.subr.bf16.mxu1 %v1135_v19  ;;  %v1155_v22 = vld [vmem:[%s1279_s0 + $0x70] sm:$0xff]   ;;  %v1161_v23 = vld [vmem:[%s1279_s0 + $0xa0] sm:$0xff]   ;;  %v985_v31 = vmov 0   ;;  %vm491_vm2 = vcmask 130048  }
  0x1d   :  { %v1168_v24 = vld [vmem:[%s1279_s0 + $0x30] sm:$0xff]   ;;  %v1177_v25 = vld [vmem:[%s1279_s0 + $0x78] sm:$0xff]   ;;  %v1182_v26 = vld [vmem:[%s1279_s0 + $0xa8] sm:$0xff]   ;;  %929 = vset.pattern.permute.xlu0 %v985_v31  ;;  %s986_s11 = smov [#allocation3]  }
  0x1e   :  { %874 = vmatpush3.bf16.msra.mxu0 %v1141_v20  ;;  %v1187_v27 = vld [vmem:[%s1279_s0 + $0x38] sm:$0xff]   ;;  %v1196_v28 = vld [vmem:[%s1279_s0 + $0xb0] sm:$0xff]   ;;  %v249_v30 = vld [vmem:[%s1283_s4] sm:$0xff]  ;;  %s717_s12 = sshll.u32 %s986_s11, 4  ;;  %s718_s12 = int_to_ptr.vmem [resolvable:$true] %s717_s12 }
  0x1f   :  { %786 = vmatpush3.bf16.msra.mxu1 %v1149_v21  ;;  %875 = vmatprep.subr.bf16.mxu0 %v983_v1  ;;  %v1204_v29 = vld [vmem:[%s1279_s0 + $0xb8] sm:$0xff]   ;;  %v250_v32 = vld [vmem:[%s1283_s4 + $0x8] sm:$0xff]  ;;  %v490_v4 = vld [vmem:[%s1282_s3] sm:$0x1]  ;;  %s959_s13 = scalar_lea.vmem %s718_s12, 16  ;;  %s963_s14 = scalar_lea.vmem %s718_s12, 32 }
  0x20   :  { %787 = vmatprep.subr.bf16.mxu1 %v1155_v22  ;;  %253 = vperm.xlu0 %929, %v249_v30   ;;  %v762_v10 = vld [vmem:[%s1282_s3 + $0x1] sm:$0x1]  ;;  %v764_v30 = vld [vmem:[%s1282_s3 + $0x2] sm:$0x1]  ;;  %p960_p0 = scmp.ne.s32.totalorder %s718_s12, %s959_s13  ;;  %p964_p1 = scmp.lt.s32.totalorder %s718_s12, %s718_s12 }
  0x21   :  { %p965_p2 = scmp.lt.s32.totalorder %s963_s14, %s959_s13 }
  0x22   :  { %876 = vmatpush3.bf16.msra.mxu0 %v1161_v23 }
  0x23   :  { %788 = vmatpush3.bf16.msra.mxu1 %v1168_v24  ;;  %877 = vmatprep.subr.bf16.mxu0 %v983_v1  ;;  %p966_p3 = por %p965_p2, %p964_p1 }
  0x24   :  { %789 = vmatprep.subr.bf16.mxu1 %v1177_v25  ;;  %258 = vperm.xlu0 %929, %v250_v32  }
  0x25   :  { %p967_p4 = pnand %p966_p3, %p960_p0 }
  0x26   :  { %878 = vmatpush3.bf16.msra.mxu0 %v1182_v26 }
  0x27   :  { %790 = vmatpush3.bf16.msra.mxu1 %v1187_v27  ;;  %879 = vmatprep.subr.bf16.mxu0 %v983_v1 }
  0x28   :  { %887 = vmatprep.subr.bf16.mxu1 %v983_v1 }
  0x2a   :  { %880 = vmatpush3.bf16.msra.mxu0 %v1196_v28 }
  0x2b   :  { %881 = vmatprep.subr.bf16.mxu0 %v983_v1 }
  0x2e   :  { %882 = vmatpush3.bf16.msra.mxu0 %v1204_v29 }
  0x2f   :  { %893 = vmatprep.subr.bf16.mxu0 %v983_v1 }
  0x9f   :  { %v254_v49 = vpop.permute.xlu0 %253 }
  0xa3   :  { %v259_v56 = vpop.permute.xlu0 %258 }
  0xdc   :  { %v135_v33 = vpop.f32.mrb[0].mxu0  ;;  %v187_v34 = vpop.f32.mrb[0].mxu1 }
  0xdd   :  { %v849_v35 = vpop.f32.mrb[1].mxu0  ;;  %v857_v36 = vpop.f32.mrb[1].mxu1 }
  0xde   :  { %v138_v37 = vpop.f32.mrb[2].mxu0  ;;  %v190_v38 = vpop.f32.mrb[2].mxu1 }
  0xdf   :  { %v246_v39 = vpack.c.bf16 %v138_v37, %v135_v33  ;;  %v247_v40 = vpack.c.bf16 %v190_v38, %v187_v34  ;;  %v850_v41 = vpop.f32.mrb[3].mxu0  ;;  %v858_v42 = vpop.f32.mrb[3].mxu1 }
  0xe1   :  { %437 = vmatprep.mubr.bf16.mxu1 %v247_v40 }
  0xe2   :  { %438 = vmatmul.mubr.bf16.vlgmr.msra.gmra.mrb[4].mxu1 %v246_v39 }
  0xe3   :  { %889 = vmatprep.mubr.msk.bf16.mxu1 %vm984_vm0, %v983_v1 }
  0xe4   :  { %v239_v43 = vpop.f32.mrb[4].mxu0 }
  0xe5   :  { %v865_v44 = vpop.f32.mrb[5].mxu0 }
  0xe6   :  { %v242_v45 = vpop.f32.mrb[6].mxu0 }
  0xe7   :  { %v248_v46 = vpack.c.bf16 %v242_v45, %v239_v43  ;;  %v866_v47 = vpop.f32.mrb[7].mxu0 }
  0xe9   :  { %884 = vmatmul.mubr.bf16.vlgmr.msra.gmra.mrb[8].mxu0 %v248_v46 }
  0xea   :  { %895 = vmatprep.mubr.msk.bf16.mxu0 %vm984_vm0, %v983_v1 }
 0x1b5   :  { %v791_v48 = vpop.f32.mrb[4].mxu1 }
 0x1b6   :  { %v792_v50 = vpop.f32.mrb[5].mxu1 }
 0x1b7   :  { %v793_v51 = vadd.f32 %v792_v50, %v791_v48  ;;  %v794_v52 = vpop.f32.mrb[6].mxu1 }
 0x1b8   :  { %v795_v53 = vpop.f32.mrb[7].mxu1 }
 0x1b9   :  { %v796_v54 = vadd.f32 %v795_v53, %v794_v52  ;;  %v440_v55 = vadd.f32 %v793_v51, %v254_v49 }
 0x1bb   :  { %v443_v60 = vadd.f32 %v796_v54, %v259_v56 }
 0x1bc   :  { %v480_v57 = vpop.f32.mrb[8].mxu0 }
 0x1bd   :  { %v481_v58 = vadd.f32 %v480_v57, %v440_v55  ;;  %v885_v59 = vpop.f32.mrb[9].mxu0 }
 0x1be   :  { %v483_v61 = vpop.f32.mrb[10].mxu0 }
 0x1bf   :  { %v484_v62 = vadd.f32 %v483_v61, %v443_v60  ;;  %v886_v63 = vpop.f32.mrb[11].mxu0  ;;  %v487_v0 = vmax.f32 %v481_v58, 0.0 }
 0x1c1   :  { %v488_v2 = vmax.f32 %v484_v62, 0.0 }
 0x1c3   :  { %v489_v3 = vpack.c.bf16 %v488_v2, %v487_v0 }
 0x1c5   :  { %888 = vmatpush3.bf16.msra.mxu1 %v489_v3  ;;  %894 = vmatpush3.bf16.msra.mxu0 %v489_v3 }
 0x1c6   :  { %899 = vmatprep.subr.bf16.mxu1 %v983_v1  ;;  %812 = vmatprep.subr.bf16.mxu0 %v1045_v5 }
 0x1c8   :  { %890 = vmatmul.mubr.msk.bf16.vlgmr.msra.gmra.mrb[8].mxu1 %vm491_vm2, %v490_v4  ;;  %896 = vmatmul.mubr.msk.bf16.vlgmr.msra.gmra.mrb[12].mxu0 %vm491_vm2, %v762_v10 }
 0x1c9   :  { %900 = vmatpush3.bf16.msra.mxu1 %v489_v3  ;;  %901 = vmatprep.mubr.msk.bf16.mxu1 %vm984_vm0, %v983_v1 }
 0x1ca   :  { %813 = vmatpush3.bf16.msra.mxu0 %v1052_v6  ;;  %905 = vmatprep.subr.bf16.mxu1 %v983_v1 }
 0x1cb   :  { %814 = vmatprep.subr.bf16.mxu0 %v1057_v7 }
 0x1ce   :  { %815 = vmatpush3.bf16.msra.mxu0 %v1068_v8 }
 0x1cf   :  { %816 = vmatprep.subr.bf16.mxu0 %v1074_v9 }
 0x1d0   :  { %902 = vmatmul.mubr.msk.bf16.vlgmr.msra.gmra.mrb[12].mxu1 %vm491_vm2, %v764_v30 }
 0x1d1   :  { %906 = vmatpush3.bf16.msra.mxu1 %v1082_v11  ;;  %921 = vmatprep.mubr.msk.bf16.mxu1 %vm984_vm0, %v983_v1 }
 0x1d2   :  { %817 = vmatpush3.bf16.msra.mxu0 %v1089_v12  ;;  %907 = vmatprep.subr.bf16.mxu1 %v983_v1 }
 0x1d3   :  { %818 = vmatprep.subr.bf16.mxu0 %v1095_v13 }
 0x1d5   :  { %908 = vmatpush3.bf16.msra.mxu1 %v1102_v14 }
 0x1d6   :  { %819 = vmatpush3.bf16.msra.mxu0 %v1111_v15  ;;  %909 = vmatprep.subr.bf16.mxu1 %v983_v1 }
 0x1d7   :  { %820 = vmatprep.subr.bf16.mxu0 %v1117_v16 }
 0x1d9   :  { %910 = vmatpush3.bf16.msra.mxu1 %v1122_v17 }
 0x1da   :  { %821 = vmatpush3.bf16.msra.mxu0 %v1128_v18  ;;  %911 = vmatprep.subr.bf16.mxu1 %v983_v1 }
 0x1db   :  { %822 = vmatprep.subr.bf16.mxu0 %v1135_v19 }
 0x1dd   :  { %912 = vmatpush3.bf16.msra.mxu1 %v1141_v20 }
 0x1de   :  { %823 = vmatpush3.bf16.msra.mxu0 %v1149_v21  ;;  %913 = vmatprep.subr.bf16.mxu1 %v983_v1 }
 0x1df   :  { %824 = vmatprep.subr.bf16.mxu0 %v1155_v22 }
 0x1e1   :  { %914 = vmatpush3.bf16.msra.mxu1 %v1161_v23 }
 0x1e2   :  { %825 = vmatpush3.bf16.msra.mxu0 %v1168_v24  ;;  %915 = vmatprep.subr.bf16.mxu1 %v983_v1 }
 0x1e3   :  { %826 = vmatprep.subr.bf16.mxu0 %v1177_v25  ;;  %v629_v25 = vstv %s1284_s5 }
 0x1e5   :  { %916 = vmatpush3.bf16.msra.mxu1 %v1182_v26 }
 0x1e6   :  { %827 = vmatpush3.bf16.msra.mxu0 %v1187_v27  ;;  %917 = vmatprep.subr.bf16.mxu1 %v983_v1 }
 0x1e9   :  { %918 = vmatpush3.bf16.msra.mxu1 %v1196_v28 }
 0x1ea   :  { %919 = vmatprep.subr.bf16.mxu1 %v983_v1 }
 0x1ed   :  { %920 = vmatpush3.bf16.msra.mxu1 %v1204_v29 }
 0x29b   :  { %v574_v5 = vpop.f32.mrb[12].mxu0  ;;  %v529_v6 = vpop.f32.mrb[8].mxu1 }
 0x29c   :  { %v626_v7 = vpack.c.bf16 %v574_v5, %v574_v5  ;;  %v625_v8 = vpack.c.bf16 %v529_v6, %v529_v6  ;;  %v891_v9 = vpop.f32.mrb[9].mxu1  ;;  %v897_v11 = vpop.f32.mrb[13].mxu0 }
 0x29d   :  { %v532_v12 = vpop.f32.mrb[10].mxu1  ;;  %v577_v13 = vpop.f32.mrb[14].mxu0 }
 0x29e   :  { %662 = vmatprep.mubr.bf16.mxu0 %v626_v7  ;;  %v892_v14 = vpop.f32.mrb[11].mxu1  ;;  %v898_v15 = vpop.f32.mrb[15].mxu0 }
 0x29f   :  { %663 = vmatmul.mubr.bf16.vlgmr.msra.gmra.mrb[16].mxu0 %v625_v8 }
 0x2a3   :  { %v619_v16 = vpop.f32.mrb[12].mxu1 }
 0x2a4   :  { %v627_v17 = vpack.c.bf16 %v619_v16, %v619_v16  ;;  %v903_v18 = vpop.f32.mrb[13].mxu1 }
 0x2a5   :  { %v622_v19 = vpop.f32.mrb[14].mxu1 }
 0x2a6   :  { %922 = vmatmul.mubr.bf16.vlgmr.msra.gmra.mrb[16].mxu1 %v627_v17  ;;  %v904_v1 = vpop.f32.mrb[15].mxu1 }
 0x372   :  { %v828_v20 = vpop.f32.mrb[16].mxu0 }
 0x373   :  { %v829_v21 = vpop.f32.mrb[17].mxu0 }
 0x374   :  { %v830_v22 = vadd.f32 %v829_v21, %v828_v20  ;;  %v831_v23 = vpop.f32.mrb[18].mxu0 }
 0x375   :  { %v832_v24 = vpop.f32.mrb[19].mxu0 }
 0x376   :  { %v665_v26 = vadd.f32 %v830_v22, %v629_v25 }
 0x379   :  { %v704_v27 = vpop.f32.mrb[16].mxu1 }
 0x37a   :  { %v705_v28 = vadd.f32 %v704_v27, %v665_v26  ;;  %v923_v29 = vpop.f32.mrb[17].mxu1 }
 0x37b   :  { %v707_v31 = vpop.f32.mrb[18].mxu1 }
 0x37c   :  { %710 = vst [vmem:[#allocation3] sm:$0x1] %v705_v28  ;;  %v924_v32 = vpop.f32.mrb[19].mxu1 }
 0x37d   :  { %970 = shalt.err (!%p967_p4)
}
 0x37e   :  { %s971_s16 = scalar_lea.hbm %s1285_s6, 16 }
 0x37f   :  { %p972_p5 = scmp.ne.s32.totalorder %s1285_s6, %s971_s16  ;;  %p975_p6 = scmp.lt.u32.totalorder %s971_s16, %s1285_s6 }
 0x381   :  { %p977_p7 = pnand %p975_p6, %p972_p5 }
 0x383   :  { %980 = shalt.err (!%p977_p7)
}
 0x384   :  { %720 = dma.vmem_to_hbm [thread:$0]  %s718_s12, 16, %s1285_s6, [#allocation4]  }
 0x385   :  { %981 = dma.done.wait [#allocation4], 16  }
 0x386   :  { %982 = vsyncadd [#allocation4], 4294967280 }
 0x387   :  { %724 = vsyncpa [#allocation4], 1 }

</bundles_post_ra>
